<compile_context>
chip_gen: v7x
topology: tpu7x:2x2x1
jax: 0.10.0
libtpu: 0.0.40
codegen_flags: <defaults>
</compile_context>

<pallas_src>
import math

import jax
import jax.numpy as jnp
from jax import lax
from jax.experimental import pallas as pl
from jax.experimental.pallas import tpu as pltpu


def _paifilter_kernel(x_ref, m_ref, b1_ref, w2_ref, b2_ref, out_ref):
    """One batch tile: x_ref (C, block_b, N) -> out_ref (C, block_b, 1)."""
    C = x_ref.shape[0]
    mm_dtype = m_ref.dtype                 # bf16 (or f32 if prepare() was told so)

    b1 = b1_ref[...]                       # (1, H)  f32
    w2 = w2_ref[...]                       # (1, H)  f32
    b2 = b2_ref[...]                       # (1, 1)  f32

    logits = []
    for c in range(C):                     # C == 3: static unroll; leading-dim slices are free
        xc = x_ref[c].astype(mm_dtype)                                     # (block_b, N)
        hc = jnp.dot(xc, m_ref[c], preferred_element_type=jnp.float32)     # MXU, f32 acc
        hc = hc + b1
        hc = jnp.where(hc > 0.0, hc, 0.01 * hc)                            # LeakyReLU(0.01)
        # fc2 (H -> 1): VPU multiply + cross-lane reduce (avoids a 1-lane matmul)
        logits.append(jnp.sum(hc * w2, axis=-1, keepdims=True) + b2)       # (block_b, 1)

    # Numerically safe softmax over the C channels: true per-group (per-row) max.
    mx = logits[0]
    for c in range(1, C):
        mx = jnp.maximum(mx, logits[c])
    es = [jnp.exp(l - mx) for l in logits]
    den = es[0]
    for c in range(1, C):
        den = den + es[c]
    for c in range(C):
        out_ref[c] = (es[c] / den).astype(out_ref.dtype)


def paifilter_prepare(w, fc1_w, fc1_b, fc2_w, fc2_b, *, matmul_dtype=jnp.bfloat16):
    """Fold circular-conv + fc1 into one (C, N, H) matrix. Call once per weight set.

    w: (C, N)   fc1_w: (H, N)  fc1_b: (H,)  fc2_w: (1, H)  fc2_b: (1,)
    """
    C, N = w.shape
    H = fc1_w.shape[0]
    f32 = jnp.float32
    hp = lax.Precision.HIGHEST

    # A[c, i, :] = irfft(rfft(e_i)*rfft(w_c))  == the (ortho-normalized) circular-conv
    # matrix, built by applying the exact reference op to the identity basis.
    eye = jnp.eye(N, dtype=f32)
    ef = jnp.fft.rfft(eye, axis=1, norm="ortho")                       # (N, F)
    wf = jnp.fft.rfft(w.astype(f32), axis=1, norm="ortho")             # (C, F)
    A = jnp.fft.irfft(ef[None, :, :] * wf[:, None, :], n=N, axis=2,
                      norm="ortho")                                    # (C, N, N)
    M = jnp.einsum("cij,jh->cih", A, fc1_w.T.astype(f32),
                   precision=hp).astype(matmul_dtype)                  # (C, N, H)

    b1 = fc1_b.reshape(1, H).astype(f32)
    w2 = fc2_w.reshape(1, H).astype(f32)
    b2 = fc2_b.reshape(1, 1).astype(f32)
    return M, b1, w2, b2


def paifilter_forward(x, consts, *, block_b=None):
    """PAIFILTER.forward.  x: (B, C, N); consts from paifilter_prepare().
    Returns softmax-over-channels predictions of shape (B, C, 1)."""
    M, b1, w2, b2 = consts
    B, C, N = x.shape
    H = b1.shape[-1]
    assert M.shape == (C, N, H)

    try:
        vmem_cap = int(pltpu.get_tpu_info().vmem_capacity_bytes)
    except Exception:                      # interpret mode / info not available
        vmem_cap = 64 << 20                # conservative: v7x per-TC VMEM

    if block_b is None:
        # Fill the MXU row dimension (target up to 512 rows per matmul, multiple of 8)
        # while keeping the double-buffered input block well under the VMEM cap.
        bytes_per_b = C * max(N, 128) * x.dtype.itemsize
        budget_rows = max(8, (vmem_cap // 4) // (2 * bytes_per_b))
        target = int(min(512, budget_rows))
        if B <= target:
            block_b = B                    # tiny batch: one fat step, no pointless split
        else:
            divs = [d for d in range(8, target + 1, 8) if B % d == 0]
            block_b = max(divs) if divs else B
    assert B % block_b == 0, "block_b must divide the batch size"
    assert block_b == B or block_b % 8 == 0, "block_b must be B or a multiple of 8"
    nb = B // block_b                      # (on v7x, an even nb feeds both TensorCores)

    # Channel-major layout: dense matmul operands + free channel slices in the kernel.
    x_cm = jnp.transpose(x, (1, 0, 2))     # (C, B, N), native dtype

    def _tile_bytes(shape, itemsize):
        s = [int(d) for d in shape]
        s[-1] = pl.cdiv(s[-1], 128) * 128
        s[-2] = pl.cdiv(s[-2], 8) * 8
        n = 1
        for d in s:
            n *= d
        return n * itemsize

    const_bytes = sum(_tile_bytes(a.shape, a.dtype.itemsize) for a in (M, b1, w2, b2))
    stream_bytes = 2 * (_tile_bytes((C, block_b, N), x.dtype.itemsize)
                        + _tile_bytes((C, block_b, 1), 4))
    work_bytes = 6 * _tile_bytes((block_b, max(H, N)), 4)     # f32 intermediates headroom
    needed = 2 * const_bytes + stream_bytes + work_bytes + (2 << 20)
    vmem_limit = int(min(max(needed, 32 << 20), int(0.75 * vmem_cap)))

    out = pl.pallas_call(
        _paifilter_kernel,
        out_shape=jax.ShapeDtypeStruct((C, B, 1), jnp.float32),
        grid=(nb,),
        in_specs=[
            pl.BlockSpec((C, block_b, N), lambda i: (0, i, 0)),   # streamed input tile
            pl.BlockSpec(M.shape, lambda i: (0, 0, 0)),           # folded conv+fc1 matrix
            pl.BlockSpec(b1.shape, lambda i: (0, 0)),
            pl.BlockSpec(w2.shape, lambda i: (0, 0)),
            pl.BlockSpec(b2.shape, lambda i: (0, 0)),
        ],
        out_specs=pl.BlockSpec((C, block_b, 1), lambda i: (0, i, 0)),
        compiler_params=pltpu.CompilerParams(
            dimension_semantics=("parallel",),
            vmem_limit_bytes=vmem_limit,
        ),
    )(x_cm, M, b1, w2, b2)

    return jnp.transpose(out, (1, 0, 2)).astype(x.dtype)


def _reference(x, w, fc1_w, fc1_b, fc2_w, fc2_b):
    """Pure-JAX replica of PAIFILTER.forward (torch semantics)."""
    N = x.shape[-1]
    hp = lax.Precision.HIGHEST
    xf = jnp.fft.rfft(x.astype(jnp.float32), axis=2, norm="ortho")
    wf = jnp.fft.rfft(w.astype(jnp.float32), axis=1, norm="ortho")
    conv = jnp.fft.irfft(xf * wf[None], n=N, axis=2, norm="ortho")
    h = jnp.einsum("bcn,hn->bch", conv, fc1_w, precision=hp) + fc1_b
    h = jnp.where(h > 0, h, 0.01 * h)                           # LeakyReLU(0.01)
    logits = jnp.einsum("bch,oh->bco", h, fc2_w, precision=hp) + fc2_b
    return jax.nn.softmax(logits, axis=1)                       # softmax over channels


if __name__ == "__main__":
    key = jax.random.PRNGKey(0)
    kx, kw, ka, kb, kc, kd = jax.random.split(key, 6)

    # batch=4, channels=3 (fixed by self.w having 3 rows), seq_len=16, hidden=32
    B, C, N, H = 4, 3, 16, 32

    x = jax.random.normal(kx, (B, C, N), dtype=jnp.float32)
    w = 0.02 * jax.random.normal(kw, (C, N), dtype=jnp.float32)            # self.w
    fc1_w = jax.random.normal(ka, (H, N), dtype=jnp.float32) / math.sqrt(N)
    fc1_b = 0.1 * jax.random.normal(kb, (H,), dtype=jnp.float32)
    fc2_w = jax.random.normal(kc, (1, H), dtype=jnp.float32) / math.sqrt(H)
    fc2_b = 0.1 * jax.random.normal(kd, (1,), dtype=jnp.float32)

    consts = paifilter_prepare(w, fc1_w, fc1_b, fc2_w, fc2_b)   # once per weight set
    out = paifilter_forward(x, consts)
    out = jax.block_until_ready(out)

    ref = _reference(x, w, fc1_w, fc1_b, fc2_w, fc2_b)
    assert out.shape == (B, C, 1)
    assert jnp.allclose(jnp.sum(out, axis=1), 1.0, atol=1e-5), "softmax must sum to 1"
    # bf16 matmul operands (f32 accumulation) -> relaxed tolerance vs the f32 fft reference
    assert jnp.allclose(out, ref, atol=1e-2, rtol=1e-2), "mismatch vs jnp.fft reference"

    print("KERNEL_OK")
</pallas_src>

<mosaic_0001>
module attributes {stable_mosaic.version = 11 : i64} {
  func.func @_paifilter_kernel(%arg0: i32, %arg1: memref<3x4x16xf32, #tpu.memory_space<vmem>>, %arg2: memref<3x16x32xbf16, #tpu.memory_space<vmem>>, %arg3: memref<1x32xf32, #tpu.memory_space<vmem>>, %arg4: memref<1x32xf32, #tpu.memory_space<vmem>>, %arg5: memref<1x1xf32, #tpu.memory_space<vmem>>, %arg6: memref<3x4x1xf32, #tpu.memory_space<vmem>>) attributes {dimension_semantics = [#tpu.dimension_semantics<parallel>], iteration_bounds = array<i64: 1>, scalar_prefetch = 0 : i64, scratch_operands = 0 : i64, tpu.core_type = #tpu.core_type<tc>, window_params = [{transform_indices = @transform_0, window_bounds = array<i64: 3, 4, 16>}, {pipeline_mode = #tpu.pipeline_mode<synchronous>, transform_indices = @transform_1, window_bounds = array<i64: 3, 16, 32>}, {pipeline_mode = #tpu.pipeline_mode<synchronous>, transform_indices = @transform_2, window_bounds = array<i64: 1, 32>}, {pipeline_mode = #tpu.pipeline_mode<synchronous>, transform_indices = @transform_3, window_bounds = array<i64: 1, 32>}, {pipeline_mode = #tpu.pipeline_mode<synchronous>, transform_indices = @transform_4, window_bounds = array<i64: 1, 1>}, {transform_indices = @transform_5, window_bounds = array<i64: 3, 4, 1>}]} {
    %c0 = arith.constant 0 : index
    %c0_0 = arith.constant 0 : index
    %0 = vector.load %arg3[%c0, %c0_0] : memref<1x32xf32, #tpu.memory_space<vmem>>, vector<1x32xf32>
    %c0_1 = arith.constant 0 : index
    %c0_2 = arith.constant 0 : index
    %1 = vector.load %arg4[%c0_1, %c0_2] : memref<1x32xf32, #tpu.memory_space<vmem>>, vector<1x32xf32>
    %c0_3 = arith.constant 0 : index
    %c0_4 = arith.constant 0 : index
    %2 = vector.load %arg5[%c0_3, %c0_4] : memref<1x1xf32, #tpu.memory_space<vmem>>, vector<1x1xf32>
    %c0_5 = arith.constant 0 : index
    %c0_6 = arith.constant 0 : index
    %c0_7 = arith.constant 0 : index
    %3 = vector.load %arg1[%c0_5, %c0_6, %c0_7] : memref<3x4x16xf32, #tpu.memory_space<vmem>>, vector<1x4x16xf32>
    %4 = vector.shape_cast %3 : vector<1x4x16xf32> to vector<4x16xf32>
    %5 = arith.truncf %4 : vector<4x16xf32> to vector<4x16xbf16>
    %c0_8 = arith.constant 0 : index
    %c0_9 = arith.constant 0 : index
    %c0_10 = arith.constant 0 : index
    %6 = vector.load %arg2[%c0_8, %c0_9, %c0_10] : memref<3x16x32xbf16, #tpu.memory_space<vmem>>, vector<1x16x32xbf16>
    %7 = vector.shape_cast %6 : vector<1x16x32xbf16> to vector<16x32xbf16>
    %cst = arith.constant dense<0.000000e+00> : vector<4x32xf32>
    %8 = tpu.matmul %5, %7, %cst {dimension_numbers = #tpu.dot_dimension_numbers<[1], [0], [0], [1], [0, 0, 1, 1], [], []>} : vector<4x16xbf16>, vector<16x32xbf16>, vector<4x32xf32> -> vector<4x32xf32>
    %9 = vector.broadcast %0 : vector<1x32xf32> to vector<4x32xf32>
    %10 = arith.addf %8, %9 : vector<4x32xf32>
    %cst_11 = arith.constant 0.000000e+00 : f32
    %11 = vector.broadcast %cst_11 : f32 to vector<4x32xf32>
    %12 = arith.cmpf ogt, %10, %11 : vector<4x32xf32>
    %cst_12 = arith.constant 0.00999999977 : f32
    %13 = vector.broadcast %cst_12 : f32 to vector<4x32xf32>
    %14 = arith.mulf %13, %10 : vector<4x32xf32>
    %15 = arith.select %12, %10, %14 : vector<4x32xi1>, vector<4x32xf32>
    %16 = vector.broadcast %1 : vector<1x32xf32> to vector<4x32xf32>
    %17 = arith.mulf %15, %16 : vector<4x32xf32>
    %cst_13 = arith.constant dense<0.000000e+00> : vector<4xf32>
    %18 = vector.multi_reduction <add>, %17, %cst_13 [1] : vector<4x32xf32> to vector<4xf32>
    %19 = vector.shape_cast %18 : vector<4xf32> to vector<4x1xf32>
    %20 = vector.broadcast %2 : vector<1x1xf32> to vector<4x1xf32>
    %21 = arith.addf %19, %20 : vector<4x1xf32>
    %c1 = arith.constant 1 : index
    %c0_14 = arith.constant 0 : index
    %c0_15 = arith.constant 0 : index
    %22 = vector.load %arg1[%c1, %c0_14, %c0_15] : memref<3x4x16xf32, #tpu.memory_space<vmem>>, vector<1x4x16xf32>
    %23 = vector.shape_cast %22 : vector<1x4x16xf32> to vector<4x16xf32>
    %24 = arith.truncf %23 : vector<4x16xf32> to vector<4x16xbf16>
    %c1_16 = arith.constant 1 : index
    %c0_17 = arith.constant 0 : index
    %c0_18 = arith.constant 0 : index
    %25 = vector.load %arg2[%c1_16, %c0_17, %c0_18] : memref<3x16x32xbf16, #tpu.memory_space<vmem>>, vector<1x16x32xbf16>
    %26 = vector.shape_cast %25 : vector<1x16x32xbf16> to vector<16x32xbf16>
    %cst_19 = arith.constant dense<0.000000e+00> : vector<4x32xf32>
    %27 = tpu.matmul %24, %26, %cst_19 {dimension_numbers = #tpu.dot_dimension_numbers<[1], [0], [0], [1], [0, 0, 1, 1], [], []>} : vector<4x16xbf16>, vector<16x32xbf16>, vector<4x32xf32> -> vector<4x32xf32>
    %28 = vector.broadcast %0 : vector<1x32xf32> to vector<4x32xf32>
    %29 = arith.addf %27, %28 : vector<4x32xf32>
    %cst_20 = arith.constant 0.000000e+00 : f32
    %30 = vector.broadcast %cst_20 : f32 to vector<4x32xf32>
    %31 = arith.cmpf ogt, %29, %30 : vector<4x32xf32>
    %cst_21 = arith.constant 0.00999999977 : f32
    %32 = vector.broadcast %cst_21 : f32 to vector<4x32xf32>
    %33 = arith.mulf %32, %29 : vector<4x32xf32>
    %34 = arith.select %31, %29, %33 : vector<4x32xi1>, vector<4x32xf32>
    %35 = vector.broadcast %1 : vector<1x32xf32> to vector<4x32xf32>
    %36 = arith.mulf %34, %35 : vector<4x32xf32>
    %cst_22 = arith.constant dense<0.000000e+00> : vector<4xf32>
    %37 = vector.multi_reduction <add>, %36, %cst_22 [1] : vector<4x32xf32> to vector<4xf32>
    %38 = vector.shape_cast %37 : vector<4xf32> to vector<4x1xf32>
    %39 = vector.broadcast %2 : vector<1x1xf32> to vector<4x1xf32>
    %40 = arith.addf %38, %39 : vector<4x1xf32>
    %c2 = arith.constant 2 : index
    %c0_23 = arith.constant 0 : index
    %c0_24 = arith.constant 0 : index
    %41 = vector.load %arg1[%c2, %c0_23, %c0_24] : memref<3x4x16xf32, #tpu.memory_space<vmem>>, vector<1x4x16xf32>
    %42 = vector.shape_cast %41 : vector<1x4x16xf32> to vector<4x16xf32>
    %43 = arith.truncf %42 : vector<4x16xf32> to vector<4x16xbf16>
    %c2_25 = arith.constant 2 : index
    %c0_26 = arith.constant 0 : index
    %c0_27 = arith.constant 0 : index
    %44 = vector.load %arg2[%c2_25, %c0_26, %c0_27] : memref<3x16x32xbf16, #tpu.memory_space<vmem>>, vector<1x16x32xbf16>
    %45 = vector.shape_cast %44 : vector<1x16x32xbf16> to vector<16x32xbf16>
    %cst_28 = arith.constant dense<0.000000e+00> : vector<4x32xf32>
    %46 = tpu.matmul %43, %45, %cst_28 {dimension_numbers = #tpu.dot_dimension_numbers<[1], [0], [0], [1], [0, 0, 1, 1], [], []>} : vector<4x16xbf16>, vector<16x32xbf16>, vector<4x32xf32> -> vector<4x32xf32>
    %47 = vector.broadcast %0 : vector<1x32xf32> to vector<4x32xf32>
    %48 = arith.addf %46, %47 : vector<4x32xf32>
    %cst_29 = arith.constant 0.000000e+00 : f32
    %49 = vector.broadcast %cst_29 : f32 to vector<4x32xf32>
    %50 = arith.cmpf ogt, %48, %49 : vector<4x32xf32>
    %cst_30 = arith.constant 0.00999999977 : f32
    %51 = vector.broadcast %cst_30 : f32 to vector<4x32xf32>
    %52 = arith.mulf %51, %48 : vector<4x32xf32>
    %53 = arith.select %50, %48, %52 : vector<4x32xi1>, vector<4x32xf32>
    %54 = vector.broadcast %1 : vector<1x32xf32> to vector<4x32xf32>
    %55 = arith.mulf %53, %54 : vector<4x32xf32>
    %cst_31 = arith.constant dense<0.000000e+00> : vector<4xf32>
    %56 = vector.multi_reduction <add>, %55, %cst_31 [1] : vector<4x32xf32> to vector<4xf32>
    %57 = vector.shape_cast %56 : vector<4xf32> to vector<4x1xf32>
    %58 = vector.broadcast %2 : vector<1x1xf32> to vector<4x1xf32>
    %59 = arith.addf %57, %58 : vector<4x1xf32>
    %60 = arith.maximumf %21, %40 : vector<4x1xf32>
    %61 = arith.maximumf %60, %59 : vector<4x1xf32>
    %62 = arith.subf %21, %61 : vector<4x1xf32>
    %63 = math.exp %62 : vector<4x1xf32>
    %64 = arith.subf %40, %61 : vector<4x1xf32>
    %65 = math.exp %64 : vector<4x1xf32>
    %66 = arith.subf %59, %61 : vector<4x1xf32>
    %67 = math.exp %66 : vector<4x1xf32>
    %68 = arith.addf %63, %65 : vector<4x1xf32>
    %69 = arith.addf %68, %67 : vector<4x1xf32>
    %70 = arith.divf %63, %69 : vector<4x1xf32>
    %c0_32 = arith.constant 0 : index
    %c0_33 = arith.constant 0 : index
    %c0_34 = arith.constant 0 : index
    %71 = vector.load %arg6[%c0_32, %c0_33, %c0_34] : memref<3x4x1xf32, #tpu.memory_space<vmem>>, vector<1x4x1xf32>
    %72 = vector.shape_cast %71 : vector<1x4x1xf32> to vector<4x1xf32>
    %73 = vector.shape_cast %70 : vector<4x1xf32> to vector<1x4x1xf32>
    tpu.vector_store %arg6[%c0_32, %c0_33, %c0_34], %73 {strides = array<i32>} : memref<3x4x1xf32, #tpu.memory_space<vmem>>, vector<1x4x1xf32>,
    %74 = arith.divf %65, %69 : vector<4x1xf32>
    %c1_35 = arith.constant 1 : index
    %c0_36 = arith.constant 0 : index
    %c0_37 = arith.constant 0 : index
    %75 = vector.load %arg6[%c1_35, %c0_36, %c0_37] : memref<3x4x1xf32, #tpu.memory_space<vmem>>, vector<1x4x1xf32>
    %76 = vector.shape_cast %75 : vector<1x4x1xf32> to vector<4x1xf32>
    %77 = vector.shape_cast %74 : vector<4x1xf32> to vector<1x4x1xf32>
    tpu.vector_store %arg6[%c1_35, %c0_36, %c0_37], %77 {strides = array<i32>} : memref<3x4x1xf32, #tpu.memory_space<vmem>>, vector<1x4x1xf32>,
    %78 = arith.divf %67, %69 : vector<4x1xf32>
    %c2_38 = arith.constant 2 : index
    %c0_39 = arith.constant 0 : index
    %c0_40 = arith.constant 0 : index
    %79 = vector.load %arg6[%c2_38, %c0_39, %c0_40] : memref<3x4x1xf32, #tpu.memory_space<vmem>>, vector<1x4x1xf32>
    %80 = vector.shape_cast %79 : vector<1x4x1xf32> to vector<4x1xf32>
    %81 = vector.shape_cast %78 : vector<4x1xf32> to vector<1x4x1xf32>
    tpu.vector_store %arg6[%c2_38, %c0_39, %c0_40], %81 {strides = array<i32>} : memref<3x4x1xf32, #tpu.memory_space<vmem>>, vector<1x4x1xf32>,
    return
  }
  func.func @transform_0(%arg0: i32) -> (i32, i32, i32) {
    %c0_i32 = arith.constant 0 : i32
    %c0_i32_0 = arith.constant 0 : i32
    %c0_i32_1 = arith.constant 0 : i32
    return %c0_i32, %arg0, %c0_i32_0 : i32, i32, i32
  }
  func.func @transform_1(%arg0: i32) -> (i32, i32, i32) {
    %c0_i32 = arith.constant 0 : i32
    %c0_i32_0 = arith.constant 0 : i32
    %c0_i32_1 = arith.constant 0 : i32
    %c0_i32_2 = arith.constant 0 : i32
    return %c0_i32, %c0_i32_0, %c0_i32_1 : i32, i32, i32
  }
  func.func @transform_2(%arg0: i32) -> (i32, i32) {
    %c0_i32 = arith.constant 0 : i32
    %c0_i32_0 = arith.constant 0 : i32
    %c0_i32_1 = arith.constant 0 : i32
    return %c0_i32, %c0_i32_0 : i32, i32
  }
  func.func @transform_3(%arg0: i32) -> (i32, i32) {
    %c0_i32 = arith.constant 0 : i32
    %c0_i32_0 = arith.constant 0 : i32
    %c0_i32_1 = arith.constant 0 : i32
    return %c0_i32, %c0_i32_0 : i32, i32
  }
  func.func @transform_4(%arg0: i32) -> (i32, i32) {
    %c0_i32 = arith.constant 0 : i32
    %c0_i32_0 = arith.constant 0 : i32
    %c0_i32_1 = arith.constant 0 : i32
    return %c0_i32, %c0_i32_0 : i32, i32
  }
  func.func @transform_5(%arg0: i32) -> (i32, i32, i32) {
    %c0_i32 = arith.constant 0 : i32
    %c0_i32_0 = arith.constant 0 : i32
    %c0_i32_1 = arith.constant 0 : i32
    return %c0_i32, %arg0, %c0_i32_0 : i32, i32, i32
  }
}

</mosaic_0001>

<bundles_post_ra>
// kernel: tpu_custom_call.1
= control target key start
LH: loop header
LB: loop body
LE: loop exit
PB: predicated region body
PF: predicated region fallthrough
CT: control target
= control target key end

     0   :  { %s474_s0 = inlined_call_operand.hbm [shape: f32[3,4,16], index: 0, kind: input, shape index: {}]   ;;  %s475_s1 = inlined_call_operand.hbm [shape: bf16[3,16,32], index: 1, kind: input, shape index: {}]   ;;  %s476_s2 = inlined_call_operand.vmem [shape: f32[1,32], index: 2, kind: input, shape index: {}]   ;;  %s477_s3 = inlined_call_operand.vmem [shape: f32[1,32], index: 3, kind: input, shape index: {}]   ;;  %s478_s4 = inlined_call_operand.<no memory space> [shape: f32[1,1], index: 4, kind: input, shape index: {}]   ;;  %s479_s5 = inlined_call_operand.vmem [shape: f32[3,4,1], index: 5, kind: output, shape index: {}]  }
   0x1   :  { %v10_v0 = vstv %s478_s4 }
   0x2   :  { %11 = vst [vmem:[#allocation2] sm:$0x1] %v10_v0 }
   0x3   :  { %12 = vsyncpa [#allocation4], 0 }
   0x4   :  { %13 = vsyncpa [#allocation6], 0  ;;  %s390_s20 = smov [#allocation3]   ;;  %s342_s24 = scalar_lea.hbm %s474_s0, 192 }
   0x5   :  { %s19_s21 = sshll.u32 %s390_s20, 4  ;;  %p343_p0 = scmp.ne.s32.totalorder %s474_s0, %s342_s24  ;;  %s20_s21 = int_to_ptr.vmem [resolvable:$true] %s19_s21 }
   0x6   :  { %p346_p1 = scmp.lt.u32.totalorder %s342_s24, %s474_s0 }
   0x8   :  { %p348_p2 = pnand %p346_p1, %p343_p0 }
   0xa   :  { %351 = shalt.err (!%p348_p2)
}
   0xb   :  { %s352_s4 = scalar_lea.vmem %s20_s21, 192  ;;  %p357_p4 = scmp.lt.s32.totalorder %s20_s21, %s20_s21 }
   0xc   :  { %p353_p3 = scmp.ne.s32.totalorder %s20_s21, %s352_s4  ;;  %p358_p5 = scmp.lt.s32.totalorder %s352_s4, %s352_s4 }
   0xe   :  { %p359_p6 = por %p358_p5, %p357_p4 }
  0x10   :  { %p360_p7 = pnand %p359_p6, %p353_p3 }
  0x12   :  { %363 = shalt.err (!%p360_p7)
}
  0x13   :  { %s391_s29 = smov 64   ;;  %s392_s30 = smov 4  }
  0x14   :  { %25 = dma.hbm_to_vmem [thread:$0]  %s474_s0, 192, %s20_s21, [#allocation4], %s391_s29, %s391_s29, %s392_s30  }
  0x15   :  { %s393_s8 = smov [#allocation5]   ;;  %s364_s12 = scalar_lea.hbm %s475_s1, 384 }
  0x16   :  { %s31_s9 = sshll.u32 %s393_s8, 4  ;;  %p365_p8 = scmp.ne.s32.totalorder %s475_s1, %s364_s12  ;;  %s32_s9 = int_to_ptr.vmem [resolvable:$true] %s31_s9 }
  0x17   :  { %p368_p9 = scmp.lt.u32.totalorder %s364_s12, %s475_s1 }
  0x19   :  { %p370_p10 = pnand %p368_p9, %p365_p8 }
  0x1b   :  { %373 = shalt.err (!%p370_p10)
}
  0x1c   :  { %s374_s17 = scalar_lea.vmem %s32_s9, 384  ;;  %p379_p12 = scmp.lt.s32.totalorder %s32_s9, %s32_s9 }
  0x1d   :  { %p375_p11 = scmp.ne.s32.totalorder %s32_s9, %s374_s17  ;;  %p380_p13 = scmp.lt.s32.totalorder %s374_s17, %s374_s17 }
  0x1f   :  { %p381_p0 = por %p380_p13, %p379_p12 }
  0x21   :  { %p382_p1 = pnand %p381_p0, %p375_p11 }
  0x23   :  { %385 = shalt.err (!%p382_p1)
}
  0x24   :  { %37 = dma.hbm_to_vmem [thread:$0]  %s475_s1, 384, %s32_s9, [#allocation6], %s391_s29, %s391_s29, %s392_s30  }
  0x25   :  { %386 = dma.done.wait [#allocation4], 192  }
  0x26   :  { %387 = vsyncadd [#allocation4], 4294967104 }
  0x27   :  { %388 = dma.done.wait [#allocation6], 384  }
  0x28   :  { %389 = vsyncadd [#allocation6], 4294966912  ;;  %v394_v1 = vmov 0.0   ;;  %vm395_vm0 = vmmov 0   ;;  %v331_v2 = vld [vmem:[#allocation5] sm:$0xff]   ;;  %vm70_vm1 = vcmask 130048  }
  0x29   :  { %307 = vmatprep.subr.bf16.mxu0 %v394_v1  ;;  %309 = vmatprep.mubr.msk.bf16.mxu0 %vm395_vm0, %v394_v1  ;;  %v54_v3 = vld [vmem:[#allocation3] sm:$0xf]  ;;  %v332_v5 = vld [vmem:[#allocation5 + $0x8] sm:$0xff]   ;;  %v136_v7 = vld [vmem:[#allocation3 + $0x4] sm:$0xf]  ;;  %vm124_vm4 = vcmask 257024  }
  0x2a   :  { %313 = vmatprep.subr.bf16.mxu1 %v394_v1  ;;  %315 = vmatprep.mubr.msk.bf16.mxu1 %vm395_vm0, %v394_v1  ;;  %v55_v4 = vpack.c.bf16 %v54_v3, %v54_v3  ;;  %v333_v6 = vld [vmem:[#allocation5 + $0x10] sm:$0xff]   ;;  %v137_v8 = vpack.c.bf16 %v136_v7, %v136_v7  ;;  %v199_v9 = vld [vmem:[#allocation3 + $0x8] sm:$0xf]  ;;  %vm276_vm6 = vcmask 3072  }
  0x2b   :  { %308 = vmatpush3.bf16.msra.mxu0 %v331_v2  ;;  %314 = vmatpush3.bf16.msra.mxu1 %v332_v5  ;;  %v200_v10 = vpack.c.bf16 %v199_v9, %v199_v9  ;;  %v290_v11 = vld [vmem:[%s476_s2] ss:$0 sm:$0xff] }
  0x2c   :  { %319 = vmatprep.subr.bf16.mxu0 %v394_v1  ;;  %v293_v17 = vld [vmem:[%s477_s3] ss:$0 sm:$0xff] }
  0x2d   :  { %v294_v41 = vld [vmem:[#allocation2] ss:$0 sm:$0xff] }
  0x2e   :  { %310 = vmatmul.mubr.msk.bf16.vlgmr.msra.gmra.mrb[0].mxu0 %vm70_vm1, %v55_v4  ;;  %316 = vmatmul.mubr.msk.bf16.vlgmr.msra.gmra.mrb[0].mxu1 %vm70_vm1, %v137_v8 }
  0x2f   :  { %320 = vmatpush3.bf16.msra.mxu0 %v333_v6  ;;  %321 = vmatprep.mubr.msk.bf16.mxu0 %vm395_vm0, %v394_v1 }
  0x36   :  { %322 = vmatmul.mubr.msk.bf16.vlgmr.msra.gmra.mrb[4].mxu0 %vm70_vm1, %v200_v10 }
 0x101   :  { %v108_v12 = vpop.f32.mrb[0].mxu0  ;;  %v184_v16 = vpop.f32.mrb[0].mxu1 }
 0x102   :  { %v109_v13 = vadd.f32 %v290_v11, %v108_v12  ;;  %v311_v14 = vpop.f32.mrb[1].mxu0  ;;  %v185_v20 = vadd.f32 %v290_v11, %v184_v16  ;;  %v317_v21 = vpop.f32.mrb[1].mxu1 }
 0x103   :  { %v111_v15 = vpop.f32.mrb[2].mxu0  ;;  %v187_v22 = vpop.f32.mrb[2].mxu1 }
 0x104   :  { %v115_v18 = vmul.f32 0.01, %v109_v13  ;;  %v312_v19 = vpop.f32.mrb[3].mxu0  ;;  %vm114_vm2 = vcmp.gt.f32.partialorder %v109_v13, 0.0  ;;  %vm190_vm3 = vcmp.gt.f32.partialorder %v185_v20, 0.0  ;;  %v318_v24 = vpop.f32.mrb[3].mxu1 }
 0x105   :  { %v191_v23 = vmul.f32 0.01, %v185_v20 }
 0x106   :  { %v116_v25 = vsel %vm114_vm2, %v109_v13, %v115_v18 }
 0x107   :  { %v123_v26 = vmul.f32 %v293_v17, %v116_v25  ;;  %v192_v27 = vsel %vm190_vm3, %v185_v20, %v191_v23 }
 0x108   :  { %v193_v30 = vmul.f32 %v293_v17, %v192_v27 }
 0x109   :  { %v247_v28 = vpop.f32.mrb[4].mxu0  ;;  %v125_v29 = vsel %vm124_vm4, %v123_v26, 0.0 }
 0x10a   :  { %v248_v31 = vadd.f32 %v290_v11, %v247_v28  ;;  %v323_v32 = vpop.f32.mrb[5].mxu0  ;;  %126 = vadd.xlane.f32.xlu0 %v125_v29  ;;  %v194_v34 = vsel %vm124_vm4, %v193_v30, 0.0 }
 0x10b   :  { %v250_v33 = vpop.f32.mrb[6].mxu0 }
 0x10c   :  { %v254_v35 = vmul.f32 0.01, %v248_v31  ;;  %v324_v36 = vpop.f32.mrb[7].mxu0  ;;  %vm253_vm5 = vcmp.gt.f32.partialorder %v248_v31, 0.0 }
 0x10e   :  { %195 = vadd.xlane.f32.xlu0 %v194_v34  ;;  %v255_v37 = vsel %vm253_vm5, %v248_v31, %v254_v35 }
 0x10f   :  { %v256_v38 = vmul.f32 %v293_v17, %v255_v37 }
 0x111   :  { %v257_v39 = vsel %vm124_vm4, %v256_v38, 0.0 }
 0x112   :  { %258 = vadd.xlane.f32.xlu1 %v257_v39 }
 0x197   :  { %v127_v40 = vpop.xlane.xlu0 %126 }
 0x198   :  { %v134_v44 = vadd.f32 %v294_v41, %v127_v40 }
 0x19b   :  { %v196_v42 = vpop.xlane.xlu0 %195 }
 0x19c   :  { %v197_v43 = vadd.f32 %v294_v41, %v196_v42 }
 0x19e   :  { %v261_v46 = vmax.f32 %v134_v44, %v197_v43 }
 0x19f   :  { %v259_v45 = vpop.xlane.xlu1 %258 }
 0x1a0   :  { %v260_v47 = vadd.f32 %v294_v41, %v259_v45 }
 0x1a2   :  { %v262_v48 = vmax.f32 %v261_v46, %v260_v47 }
 0x1a4   :  { %v263_v49 = vsub.f32 %v134_v44, %v262_v48  ;;  %v266_v50 = vsub.f32 %v197_v43, %v262_v48  ;;  %v269_v51 = vsub.f32 %v260_v47, %v262_v48 }
 0x1a6   :  { %v264_v52 = vmul.f32 1.442695, %v263_v49  ;;  %v267_v53 = vmul.f32 1.442695, %v266_v50  ;;  %v270_v54 = vmul.f32 1.442695, %v269_v51 }
 0x1a8   :  { %334 = vpow2.f32 %v264_v52 }
 0x1a9   :  { %336 = vpow2.f32 %v267_v53 }
 0x1aa   :  { %338 = vpow2.f32 %v270_v54 }
 0x1b2   :  { %v335_v55 = vpop.eup %334 }
 0x1b3   :  { %v337_v56 = vpop.eup %336 }
 0x1b4   :  { %v272_v57 = vadd.f32 %v337_v56, %v335_v55  ;;  %v339_v58 = vpop.eup %338 }
 0x1b6   :  { %v273_v59 = vadd.f32 %v339_v58, %v272_v57 }
 0x1b8   :  { %340 = vrcp.f32 %v273_v59 }
 0x1c2   :  { %v341_v60 = vpop.eup %340 }
 0x1c3   :  { %v275_v61 = vmul.f32 %v341_v60, %v335_v55  ;;  %v278_v62 = vmul.f32 %v341_v60, %v337_v56  ;;  %v281_v63 = vmul.f32 %v341_v60, %v339_v58 }
 0x1c5   :  { %277 = vst.msk [vmem:[%s479_s5] sm:$0xf] %vm276_vm6, %v275_v61  ;;  %299 = vst.msk [vmem:[%s479_s5 + $0x4] sm:$0xf] %vm276_vm6, %v278_v62 }
 0x1c6   :  { %300 = vst.msk [vmem:[%s479_s5 + $0x8] sm:$0xf] %vm276_vm6, %v281_v63 }
 0x1c7   :  { %288 = vsyncpa [#allocation4], 1 }
 0x1c8   :  { %289 = vsyncpa [#allocation6], 1 }

</bundles_post_ra>
